<compile_context>
chip_gen: v7x
topology: tpu7x:2x2x1
jax: 0.10.0
libtpu: 0.0.40
codegen_flags: <defaults>
</compile_context>

<pallas_src>
import functools

import jax
import jax.numpy as jnp
from jax import lax
from jax.experimental import pallas as pl
from jax.experimental.pallas import tpu as pltpu


# ------------------- Fused MHA kernel (one grid step = one (b, q-tile)) -------
def _mha_kernel(q_ref, k_ref, v_ref, mask_ref,
                wq_ref, wk_ref, wv_ref, wfc_ref, gamma_ref, beta_ref,
                *rest,
                n_head, d_k, d_v, inv_temperature, eps,
                compute_dtype, exp_dtype, approx_recip, with_attn):
    if with_attn:
        out_ref, attn_ref, kh_ref, vh_ref = rest
    else:
        (out_ref, kh_ref, vh_ref), attn_ref = rest, None
    cdt = compute_dtype

    # K/V projections: computed once per batch (first q-tile), cached in VMEM
    # scratch and reused by every subsequent q-tile of the same batch.
    @pl.when(pl.program_id(1) == 0)
    def _():
        k_c = k_ref[0].astype(cdt)                       # (Lk, Dm)
        v_c = v_ref[0].astype(cdt)
        kh_ref[...] = jnp.dot(k_c, wk_ref[...],
                              preferred_element_type=jnp.float32).astype(cdt)
        vh_ref[...] = jnp.dot(v_c, wv_ref[...],
                              preferred_element_type=jnp.float32).astype(cdt)

    q_f32 = q_ref[0]                                     # (tq, Dm) f32 = residual
    mask = mask_ref[0]                                   # (1, Lk) or (tq, Lk)

    # All-head Q projection as one lane-dense matmul (f32 accumulation);
    # scale q (the small tensor) instead of the (tq, Lk) scores.
    qh = jnp.dot(q_f32.astype(cdt), wq_ref[...],
                 preferred_element_type=jnp.float32)     # (tq, H*Dk)
    qh = qh * inv_temperature

    y = q_f32                                            # residual + fc accumulation
    for h in range(n_head):                              # static unroll, tiny H
        q_h = qh[:, h * d_k:(h + 1) * d_k].astype(cdt)   # (tq, Dk)
        k_h = kh_ref[:, h * d_k:(h + 1) * d_k]           # (Lk, Dk), cdt (cached)
        v_h = vh_ref[:, h * d_v:(h + 1) * d_v]           # (Lk, Dv), cdt (cached)

        # QK^T: contract the last dims directly (MXU consumes the transposed
        # RHS natively; no XLU transpose of k_h).
        s = lax.dot_general(q_h, k_h, (((1,), (1,)), ((), ())),
                            preferred_element_type=jnp.float32)   # (tq, Lk)
        # masked_fill(-inf); fully-masked rows yield NaN, matching the PyTorch
        # reference's softmax-of-all(-inf) behavior.
        s = jnp.where(mask != 0, -jnp.inf, s)

        m = jnp.max(s, axis=-1, keepdims=True)
        # exp in exp_dtype (bf16 doubles EUP rate on v6e/v7x); sum/recip in f32.
        e = jnp.exp((s - m).astype(exp_dtype)).astype(jnp.float32)
        denom = jnp.sum(e, axis=-1, keepdims=True)
        p = e * pl.reciprocal(denom, approx=approx_recip)          # softmax

        if attn_ref is not None:
            attn_ref[h, 0] = p.astype(attn_ref.dtype)

        ctx_h = jnp.dot(p.astype(cdt), v_h,
                        preferred_element_type=jnp.float32)        # (tq, Dv)
        # Per-head fc contribution accumulated directly into y
        # (no lane-wise concat, no (tq, H*Dv) intermediate).
        y = y + jnp.dot(ctx_h.astype(cdt), wfc_ref[h * d_v:(h + 1) * d_v, :],
                        preferred_element_type=jnp.float32)

    # LayerNorm epilogue, all in VMEM.
    mean = jnp.mean(y, axis=-1, keepdims=True)
    var = jnp.mean((y - mean) ** 2, axis=-1, keepdims=True)
    norm = (y - mean) * lax.rsqrt(var + eps)
    out_ref[0] = norm * gamma_ref[...] + beta_ref[...]


# --------------------------------- Wrapper ------------------------------------
def multi_head_attention(q, k, v, mask, params, *, n_head, d_k, d_v,
                         compute_dtype=jnp.bfloat16, exp_dtype=None,
                         q_block=None, return_attn=True,
                         attn_dtype=jnp.float32):
    """Fused MHA forward.

    q, k, v : (B, Lq/Lk, d_model) float32
    mask    : nonzero = masked. Preferred: compact key-padding mask of shape
              (B, Lk) or (B, 1, Lk) (one int row per batch, broadcast in-kernel).
              A full (B, Lq, Lk) mask is also accepted.
    Returns (out, attn) like the PyTorch module when return_attn=True, else out.
    exp_dtype: softmax-exponent dtype; defaults to compute_dtype. Pass
               jnp.float32 on v5e (its EUP has no bf16 path).
    """
    compute_dtype = jnp.dtype(compute_dtype)
    exp_dtype = jnp.dtype(exp_dtype) if exp_dtype is not None else compute_dtype
    attn_dtype = jnp.dtype(attn_dtype)

    sz_b, len_q, d_model = q.shape
    _, len_k, _ = k.shape

    # --- mask: normalize; prefer a compact (B, 1, Lk) row broadcast in-kernel.
    mask = jnp.asarray(mask)
    if mask.ndim == 2:                                   # (B, Lk) key padding
        mask = mask[:, None, :]
    compact_mask = (mask.shape[1] == 1)
    mask = mask.astype(jnp.int32)

    # --- generation-aware VMEM capacity and q-tile default.
    try:
        vmem_cap = int(pltpu.get_tpu_info().vmem_capacity_bytes)
    except Exception:
        vmem_cap = 64 * 1024 * 1024                      # v7x floor: always safe
    if q_block is None:
        # v5e/v6e (128 MiB VMEM): 512 ; v7x (64 MiB): 256.
        q_block = 512 if vmem_cap >= 100 * 1024 * 1024 else 256

    # --- Lq tiling: pad to a multiple of q_block (never one huge tile).
    if len_q <= q_block:
        tq, len_q_pad = len_q, len_q
    else:
        tq = q_block
        len_q_pad = -(-len_q // q_block) * q_block
        if len_q_pad != len_q:
            q = jnp.pad(q, ((0, 0), (0, len_q_pad - len_q), (0, 0)))
            if not compact_mask:
                mask = jnp.pad(mask, ((0, 0), (0, len_q_pad - len_q), (0, 0)))
    n_q_tiles = len_q_pad // tq

    # --- lane-dense packed weights; bf16 halves weight HBM/VMEM traffic.
    wq = params["w_qs"].T.astype(compute_dtype)          # (Dm, H*Dk)
    wk = params["w_ks"].T.astype(compute_dtype)          # (Dm, H*Dk)
    wv = params["w_vs"].T.astype(compute_dtype)          # (Dm, H*Dv)
    wfc = params["fc"].T.astype(compute_dtype)           # (H*Dv, Dm)
    gamma = params["ln_gamma"].reshape(1, d_model).astype(jnp.float32)
    beta = params["ln_beta"].reshape(1, d_model).astype(jnp.float32)

    kernel = functools.partial(
        _mha_kernel, n_head=n_head, d_k=d_k, d_v=d_v,
        inv_temperature=1.0 / (float(d_k) ** 0.5), eps=1e-5,
        compute_dtype=compute_dtype, exp_dtype=exp_dtype,
        approx_recip=(compute_dtype != jnp.dtype(jnp.float32)),
        with_attn=return_attn)

    # --- scoped VMEM: always set explicitly (v5e default is only ~16 MiB),
    # capped by the chip's physical VMEM minus headroom (64 MiB on v7x).
    witem = compute_dtype.itemsize
    aitem = attn_dtype.itemsize if return_attn else 0
    mask_rows = 1 if compact_mask else tq
    vmem_est = (
        2 * 4 * (tq * d_model + 2 * len_k * d_model + tq * d_model)   # q,k,v,out
        + 2 * 4 * mask_rows * len_k                                    # mask
        + 2 * aitem * n_head * tq * len_k                              # attn out
        + 2 * witem * d_model * n_head * 2 * (d_k + d_v)               # weights
        + witem * len_k * n_head * (d_k + d_v)                         # K/V cache
        + 4 * (tq * n_head * d_k + 4 * tq * len_k
               + 2 * tq * d_model + tq * d_v))                         # temps
    vmem_limit = int(min(vmem_cap - 8 * 1024 * 1024,
                         max(2 * vmem_est, 32 * 1024 * 1024)))

    in_specs = [
        pl.BlockSpec((1, tq, d_model), lambda b, t: (b, t, 0)),        # q
        pl.BlockSpec((1, len_k, d_model), lambda b, t: (b, 0, 0)),     # k
        pl.BlockSpec((1, len_k, d_model), lambda b, t: (b, 0, 0)),     # v
        (pl.BlockSpec((1, 1, len_k), lambda b, t: (b, 0, 0)) if compact_mask
         else pl.BlockSpec((1, tq, len_k), lambda b, t: (b, t, 0))),   # mask
        pl.BlockSpec((d_model, n_head * d_k), lambda b, t: (0, 0)),    # wq
        pl.BlockSpec((d_model, n_head * d_k), lambda b, t: (0, 0)),    # wk
        pl.BlockSpec((d_model, n_head * d_v), lambda b, t: (0, 0)),    # wv
        pl.BlockSpec((n_head * d_v, d_model), lambda b, t: (0, 0)),    # wfc
        pl.BlockSpec((1, d_model), lambda b, t: (0, 0)),               # gamma
        pl.BlockSpec((1, d_model), lambda b, t: (0, 0)),               # beta
    ]

    if return_attn:
        out_shape = (
            jax.ShapeDtypeStruct((sz_b, len_q_pad, d_model), jnp.float32),
            jax.ShapeDtypeStruct((n_head, sz_b, len_q_pad, len_k), attn_dtype))
        out_specs = (
            pl.BlockSpec((1, tq, d_model), lambda b, t: (b, t, 0)),
            pl.BlockSpec((n_head, 1, tq, len_k), lambda b, t: (0, b, t, 0)))
    else:
        out_shape = jax.ShapeDtypeStruct((sz_b, len_q_pad, d_model), jnp.float32)
        out_specs = pl.BlockSpec((1, tq, d_model), lambda b, t: (b, t, 0))

    results = pl.pallas_call(
        kernel,
        out_shape=out_shape,
        grid_spec=pltpu.PrefetchScalarGridSpec(
            num_scalar_prefetch=0,
            grid=(sz_b, n_q_tiles),            # batch outer, q-tile inner:
            in_specs=in_specs,                 #   K/V/weights not re-DMA'd per tile
            out_specs=out_specs,
            scratch_shapes=[
                pltpu.VMEM((len_k, n_head * d_k), compute_dtype),   # cached K proj
                pltpu.VMEM((len_k, n_head * d_v), compute_dtype),   # cached V proj
            ]),
        compiler_params=pltpu.CompilerParams(
            # q-tile axis is "arbitrary" so the per-batch K/V cache is legal;
            # batch stays "parallel" (megacore on v7x preserved).
            dimension_semantics=("parallel", "arbitrary"),
            vmem_limit_bytes=vmem_limit),
    )(q, k, v, mask, wq, wk, wv, wfc, gamma, beta)

    if return_attn:
        out, attn_full = results
        out = out[:, :len_q, :]
        # (H, B, Lq, Lk) -> (H*B, Lq, Lk), matching torch's bmm layout.
        attn = attn_full[:, :, :len_q, :].reshape(n_head * sz_b, len_q, len_k)
        return out, attn
    return results[:, :len_q, :]


# ------------------------------ Reference (JAX) -------------------------------
def _reference(q, k, v, mask, params, *, n_head, d_k, d_v):
    sz_b, len_q, d_model = q.shape
    _, len_k, _ = k.shape
    residual = q
    qp = (q @ params["w_qs"].T).reshape(sz_b, len_q, n_head, d_k)
    kp = (k @ params["w_ks"].T).reshape(sz_b, len_k, n_head, d_k)
    vp = (v @ params["w_vs"].T).reshape(sz_b, len_k, n_head, d_v)
    qp = qp.transpose(2, 0, 1, 3).reshape(-1, len_q, d_k)
    kp = kp.transpose(2, 0, 1, 3).reshape(-1, len_k, d_k)
    vp = vp.transpose(2, 0, 1, 3).reshape(-1, len_k, d_v)
    m = jnp.tile(mask, (n_head, 1, 1))
    scores = jnp.einsum("bqd,bkd->bqk", qp, kp) / (float(d_k) ** 0.5)
    scores = jnp.where(m != 0, -jnp.inf, scores)
    attn = jax.nn.softmax(scores, axis=-1)
    out = jnp.einsum("bqk,bkd->bqd", attn, vp)
    out = out.reshape(n_head, sz_b, len_q, d_v).transpose(1, 2, 0, 3)
    out = out.reshape(sz_b, len_q, n_head * d_v)
    out = out @ params["fc"].T
    y = out + residual
    mean = jnp.mean(y, axis=-1, keepdims=True)
    var = jnp.mean((y - mean) ** 2, axis=-1, keepdims=True)
    y = (y - mean) / jnp.sqrt(var + 1e-5)
    y = y * params["ln_gamma"] + params["ln_beta"]
    return y, attn


# -------------------------------- Param init -----------------------------------
def _xavier_uniform(key, out_f, in_f):
    bound = (6.0 / (in_f + out_f)) ** 0.5
    return jax.random.uniform(key, (out_f, in_f), jnp.float32, -bound, bound)


def _make_params(key, n_head, d_model, d_k, d_v):
    k0, k1, k2, k3 = jax.random.split(key, 4)
    return {
        "w_qs": _xavier_uniform(k0, n_head * d_k, d_model),
        "w_ks": _xavier_uniform(k1, n_head * d_k, d_model),
        "w_vs": _xavier_uniform(k2, n_head * d_v, d_model),
        "fc": _xavier_uniform(k3, d_model, n_head * d_v),
        "ln_gamma": jnp.ones((d_model,), jnp.float32),
        "ln_beta": jnp.zeros((d_model,), jnp.float32),
    }


if __name__ == "__main__":
    n_head, d_model, d_k, d_v = 2, 32, 16, 16

    root = jax.random.PRNGKey(0)
    kp1, kq1, kk1, kv1, kp2, kq2, kk2, kv2 = jax.random.split(root, 8)

    # ---- Config 1: B=2, Lq=Lk=8, compact (B, Lk) key-padding mask ------------
    sz_b, seq = 2, 8
    params = _make_params(kp1, n_head, d_model, d_k, d_v)
    q = jax.random.normal(kq1, (sz_b, seq, d_model), jnp.float32)
    k = jax.random.normal(kk1, (sz_b, seq, d_model), jnp.float32)
    v = jax.random.normal(kv1, (sz_b, seq, d_model), jnp.float32)

    lengths = jnp.array([seq, seq - 2], jnp.int32)
    key_mask = (jnp.arange(seq)[None, :] >= lengths[:, None]).astype(jnp.int32)
    full_mask = jnp.broadcast_to(key_mask[:, None, :], (sz_b, seq, seq))
    full_mask = full_mask.astype(jnp.int32)

    ref_out, ref_attn = _reference(q, k, v, full_mask, params,
                                   n_head=n_head, d_k=d_k, d_v=d_v)
    ref_attn = ref_attn.reshape(n_head * sz_b, seq, seq)

    # f32 compute path: tight numerical check (compact mask, broadcast in-kernel).
    out32, attn32 = multi_head_attention(q, k, v, key_mask, params,
                                         n_head=n_head, d_k=d_k, d_v=d_v,
                                         compute_dtype=jnp.float32)
    out32 = jax.block_until_ready(out32)
    attn32 = jax.block_until_ready(attn32)
    assert out32.shape == (sz_b, seq, d_model)
    assert attn32.shape == (n_head * sz_b, seq, seq)
    assert jnp.allclose(out32, ref_out, atol=1e-4, rtol=1e-4)
    assert jnp.allclose(attn32, ref_attn, atol=1e-5, rtol=1e-5)

    # bf16 MXU path (production): bf16 exp (v6e/v7x EUP), f32 accumulation.
    out16, attn16 = multi_head_attention(q, k, v, key_mask, params,
                                         n_head=n_head, d_k=d_k, d_v=d_v,
                                         compute_dtype=jnp.bfloat16)
    out16 = jax.block_until_ready(out16)
    assert jnp.allclose(out16, ref_out, atol=5e-2, rtol=5e-2)
    assert jnp.allclose(attn16, ref_attn, atol=5e-2, rtol=5e-2)

    # attn-free path: no (H, B, Lq, Lk) HBM writeback at all.
    out_na = multi_head_attention(q, k, v, key_mask, params,
                                  n_head=n_head, d_k=d_k, d_v=d_v,
                                  compute_dtype=jnp.float32, return_attn=False)
    out_na = jax.block_until_ready(out_na)
    assert jnp.allclose(out_na, ref_out, atol=1e-4, rtol=1e-4)

    # ---- Config 2: non-divisible Lq (padded q-tiling), multiple q-tiles
    # sharing the cached K/V projections, full (B, Lq, Lk) mask. ---------------
    sz_b2, len_q2, len_k2 = 2, 40, 48
    params2 = _make_params(kp2, n_head, d_model, d_k, d_v)
    q2 = jax.random.normal(kq2, (sz_b2, len_q2, d_model), jnp.float32)
    k2 = jax.random.normal(kk2, (sz_b2, len_k2, d_model), jnp.float32)
    v2 = jax.random.normal(kv2, (sz_b2, len_k2, d_model), jnp.float32)
    lengths2 = jnp.array([len_k2, len_k2 - 5], jnp.int32)
    key_mask2 = (jnp.arange(len_k2)[None, :] >= lengths2[:, None]).astype(jnp.int32)
    full_mask2 = jnp.broadcast_to(key_mask2[:, None, :],
                                  (sz_b2, len_q2, len_k2)).astype(jnp.int32)

    ref_out2, ref_attn2 = _reference(q2, k2, v2, full_mask2, params2,
                                     n_head=n_head, d_k=d_k, d_v=d_v)
    ref_attn2 = ref_attn2.reshape(n_head * sz_b2, len_q2, len_k2)

    out2, attn2 = multi_head_attention(q2, k2, v2, full_mask2, params2,
                                       n_head=n_head, d_k=d_k, d_v=d_v,
                                       compute_dtype=jnp.float32, q_block=16)
    out2 = jax.block_until_ready(out2)
    attn2 = jax.block_until_ready(attn2)
    assert out2.shape == (sz_b2, len_q2, d_model)
    assert attn2.shape == (n_head * sz_b2, len_q2, len_k2)
    assert jnp.allclose(out2, ref_out2, atol=1e-4, rtol=1e-4)
    assert jnp.allclose(attn2, ref_attn2, atol=1e-5, rtol=1e-5)

    print("KERNEL_OK")
</pallas_src>

<mosaic_0001>
module attributes {stable_mosaic.version = 11 : i64} {
  func.func @_mha_kernel(%arg0: i32, %arg1: i32, %arg2: memref<1x8x32xf32, #tpu.memory_space<vmem>>, %arg3: memref<1x8x32xf32, #tpu.memory_space<vmem>>, %arg4: memref<1x8x32xf32, #tpu.memory_space<vmem>>, %arg5: memref<1x1x8xi32, #tpu.memory_space<vmem>>, %arg6: memref<32x32xf32, #tpu.memory_space<vmem>>, %arg7: memref<32x32xf32, #tpu.memory_space<vmem>>, %arg8: memref<32x32xf32, #tpu.memory_space<vmem>>, %arg9: memref<32x32xf32, #tpu.memory_space<vmem>>, %arg10: memref<1x32xf32, #tpu.memory_space<vmem>>, %arg11: memref<1x32xf32, #tpu.memory_space<vmem>>, %arg12: memref<1x8x32xf32, #tpu.memory_space<vmem>>, %arg13: memref<2x1x8x8xf32, #tpu.memory_space<vmem>>, %arg14: memref<8x32xf32, #tpu.memory_space<vmem>>, %arg15: memref<8x32xf32, #tpu.memory_space<vmem>>) attributes {dimension_semantics = [#tpu.dimension_semantics<parallel>, #tpu.dimension_semantics<arbitrary>], iteration_bounds = array<i64: 2, 1>, scalar_prefetch = 0 : i64, scratch_operands = 2 : i64, tpu.core_type = #tpu.core_type<tc>, window_params = [{transform_indices = @transform_0, window_bounds = array<i64: 1, 8, 32>}, {transform_indices = @transform_1, window_bounds = array<i64: 1, 8, 32>}, {transform_indices = @transform_2, window_bounds = array<i64: 1, 8, 32>}, {transform_indices = @transform_3, window_bounds = array<i64: 1, 1, 8>}, {pipeline_mode = #tpu.pipeline_mode<synchronous>, transform_indices = @transform_4, window_bounds = array<i64: 32, 32>}, {pipeline_mode = #tpu.pipeline_mode<synchronous>, transform_indices = @transform_5, window_bounds = array<i64: 32, 32>}, {pipeline_mode = #tpu.pipeline_mode<synchronous>, transform_indices = @transform_6, window_bounds = array<i64: 32, 32>}, {pipeline_mode = #tpu.pipeline_mode<synchronous>, transform_indices = @transform_7, window_bounds = array<i64: 32, 32>}, {pipeline_mode = #tpu.pipeline_mode<synchronous>, transform_indices = @transform_8, window_bounds = array<i64: 1, 32>}, {pipeline_mode = #tpu.pipeline_mode<synchronous>, transform_indices = @transform_9, window_bounds = array<i64: 1, 32>}, {transform_indices = @transform_10, window_bounds = array<i64: 1, 8, 32>}, {transform_indices = @transform_11, window_bounds = array<i64: 2, 1, 8, 8>}]} {
    %c0_i32 = arith.constant 0 : i32
    %0 = arith.cmpi eq, %arg1, %c0_i32 : i32
    %1 = arith.extui %0 : i1 to i32
    %c0_i32_0 = arith.constant 0 : i32
    %2 = arith.cmpi ne, %1, %c0_i32_0 : i32
    scf.if %2 {
      %c0_53 = arith.constant 0 : index
      %c0_54 = arith.constant 0 : index
      %c0_55 = arith.constant 0 : index
      %92 = vector.load %arg3[%c0_53, %c0_54, %c0_55] : memref<1x8x32xf32, #tpu.memory_space<vmem>>, vector<1x8x32xf32>
      %93 = vector.shape_cast %92 : vector<1x8x32xf32> to vector<8x32xf32>
      %c0_56 = arith.constant 0 : index
      %c0_57 = arith.constant 0 : index
      %c0_58 = arith.constant 0 : index
      %94 = vector.load %arg4[%c0_56, %c0_57, %c0_58] : memref<1x8x32xf32, #tpu.memory_space<vmem>>, vector<1x8x32xf32>
      %95 = vector.shape_cast %94 : vector<1x8x32xf32> to vector<8x32xf32>
      %c0_59 = arith.constant 0 : index
      %c0_60 = arith.constant 0 : index
      %96 = vector.load %arg7[%c0_59, %c0_60] : memref<32x32xf32, #tpu.memory_space<vmem>>, vector<32x32xf32>
      %cst_61 = arith.constant dense<0.000000e+00> : vector<8x32xf32>
      %97 = tpu.matmul %93, %96, %cst_61 {dimension_numbers = #tpu.dot_dimension_numbers<[1], [0], [0], [1], [0, 0, 1, 1], [], []>} : vector<8x32xf32>, vector<32x32xf32>, vector<8x32xf32> -> vector<8x32xf32>
      %c0_62 = arith.constant 0 : index
      %c0_63 = arith.constant 0 : index
      %98 = vector.load %arg14[%c0_62, %c0_63] : memref<8x32xf32, #tpu.memory_space<vmem>>, vector<8x32xf32>
      tpu.vector_store %arg14[%c0_62, %c0_63], %97 {strides = array<i32>} : memref<8x32xf32, #tpu.memory_space<vmem>>, vector<8x32xf32>,
      %c0_64 = arith.constant 0 : index
      %c0_65 = arith.constant 0 : index
      %99 = vector.load %arg8[%c0_64, %c0_65] : memref<32x32xf32, #tpu.memory_space<vmem>>, vector<32x32xf32>
      %cst_66 = arith.constant dense<0.000000e+00> : vector<8x32xf32>
      %100 = tpu.matmul %95, %99, %cst_66 {dimension_numbers = #tpu.dot_dimension_numbers<[1], [0], [0], [1], [0, 0, 1, 1], [], []>} : vector<8x32xf32>, vector<32x32xf32>, vector<8x32xf32> -> vector<8x32xf32>
      %c0_67 = arith.constant 0 : index
      %c0_68 = arith.constant 0 : index
      %101 = vector.load %arg15[%c0_67, %c0_68] : memref<8x32xf32, #tpu.memory_space<vmem>>, vector<8x32xf32>
      tpu.vector_store %arg15[%c0_67, %c0_68], %100 {strides = array<i32>} : memref<8x32xf32, #tpu.memory_space<vmem>>, vector<8x32xf32>,
    } else {
    }
    %c0 = arith.constant 0 : index
    %c0_1 = arith.constant 0 : index
    %c0_2 = arith.constant 0 : index
    %3 = vector.load %arg2[%c0, %c0_1, %c0_2] : memref<1x8x32xf32, #tpu.memory_space<vmem>>, vector<1x8x32xf32>
    %4 = vector.shape_cast %3 : vector<1x8x32xf32> to vector<8x32xf32>
    %c0_3 = arith.constant 0 : index
    %c0_4 = arith.constant 0 : index
    %c0_5 = arith.constant 0 : index
    %5 = vector.load %arg5[%c0_3, %c0_4, %c0_5] : memref<1x1x8xi32, #tpu.memory_space<vmem>>, vector<1x1x8xi32>
    %6 = vector.shape_cast %5 : vector<1x1x8xi32> to vector<1x8xi32>
    %c0_6 = arith.constant 0 : index
    %c0_7 = arith.constant 0 : index
    %7 = vector.load %arg6[%c0_6, %c0_7] : memref<32x32xf32, #tpu.memory_space<vmem>>, vector<32x32xf32>
    %cst = arith.constant dense<0.000000e+00> : vector<8x32xf32>
    %8 = tpu.matmul %4, %7, %cst {dimension_numbers = #tpu.dot_dimension_numbers<[1], [0], [0], [1], [0, 0, 1, 1], [], []>} : vector<8x32xf32>, vector<32x32xf32>, vector<8x32xf32> -> vector<8x32xf32>
    %cst_8 = arith.constant 2.500000e-01 : f32
    %9 = vector.broadcast %cst_8 : f32 to vector<8x32xf32>
    %10 = arith.mulf %8, %9 : vector<8x32xf32>
    %11 = vector.extract_strided_slice %10 {offsets = [0, 0], sizes = [8, 16], strides = [1, 1]} : vector<8x32xf32> to vector<8x16xf32>
    %c0_9 = arith.constant 0 : index
    %c0_10 = arith.constant 0 : index
    %12 = vector.load %arg14[%c0_9, %c0_10] : memref<8x32xf32, #tpu.memory_space<vmem>>, vector<8x16xf32>
    %c0_11 = arith.constant 0 : index
    %c0_12 = arith.constant 0 : index
    %13 = vector.load %arg15[%c0_11, %c0_12] : memref<8x32xf32, #tpu.memory_space<vmem>>, vector<8x16xf32>
    %cst_13 = arith.constant dense<0.000000e+00> : vector<8x8xf32>
    %14 = tpu.matmul %11, %12, %cst_13 {dimension_numbers = #tpu.dot_dimension_numbers<[1], [1], [0], [0], [0, 0, 1, 0], [], []>} : vector<8x16xf32>, vector<8x16xf32>, vector<8x8xf32> -> vector<8x8xf32>
    %c0_i32_14 = arith.constant 0 : i32
    %15 = vector.broadcast %c0_i32_14 : i32 to vector<1x8xi32>
    %16 = arith.cmpi ne, %6, %15 : vector<1x8xi32>
    %cst_15 = arith.constant 0xFF800000 : f32
    %17 = vector.shape_cast %16 : vector<1x8xi1> to vector<1x8xi1>
    %18 = vector.broadcast %17 : vector<1x8xi1> to vector<8x8xi1>
    %19 = vector.broadcast %cst_15 : f32 to vector<8x8xf32>
    %20 = arith.select %18, %19, %14 : vector<8x8xi1>, vector<8x8xf32>
    %cst_16 = arith.constant dense<0xFF800000> : vector<8xf32>
    %21 = vector.multi_reduction <maximumf>, %20, %cst_16 [1] : vector<8x8xf32> to vector<8xf32>
    %22 = vector.shape_cast %21 : vector<8xf32> to vector<8x1xf32>
    %23 = vector.broadcast %22 : vector<8x1xf32> to vector<8x8xf32>
    %24 = arith.subf %20, %23 : vector<8x8xf32>
    %25 = math.exp %24 : vector<8x8xf32>
    %cst_17 = arith.constant dense<0.000000e+00> : vector<8xf32>
    %26 = vector.multi_reduction <add>, %25, %cst_17 [1] : vector<8x8xf32> to vector<8xf32>
    %27 = vector.shape_cast %26 : vector<8xf32> to vector<8x1xf32>
    %28 = tpu.reciprocal %27 : vector<8x1xf32> -> vector<8x1xf32>
    %29 = vector.broadcast %28 : vector<8x1xf32> to vector<8x8xf32>
    %30 = arith.mulf %25, %29 : vector<8x8xf32>
    %c0_18 = arith.constant 0 : index
    %c0_19 = arith.constant 0 : index
    %c0_20 = arith.constant 0 : index
    %c0_21 = arith.constant 0 : index
    %31 = vector.load %arg13[%c0_18, %c0_19, %c0_20, %c0_21] : memref<2x1x8x8xf32, #tpu.memory_space<vmem>>, vector<1x1x8x8xf32>
    %32 = vector.shape_cast %31 : vector<1x1x8x8xf32> to vector<8x8xf32>
    %33 = vector.shape_cast %30 : vector<8x8xf32> to vector<1x1x8x8xf32>
    tpu.vector_store %arg13[%c0_18, %c0_19, %c0_20, %c0_21], %33 {strides = array<i32>} : memref<2x1x8x8xf32, #tpu.memory_space<vmem>>, vector<1x1x8x8xf32>,
    %cst_22 = arith.constant dense<0.000000e+00> : vector<8x16xf32>
    %34 = tpu.matmul %30, %13, %cst_22 {dimension_numbers = #tpu.dot_dimension_numbers<[1], [0], [0], [1], [0, 0, 1, 1], [], []>} : vector<8x8xf32>, vector<8x16xf32>, vector<8x16xf32> -> vector<8x16xf32>
    %c0_23 = arith.constant 0 : index
    %c0_24 = arith.constant 0 : index
    %35 = vector.load %arg9[%c0_23, %c0_24] : memref<32x32xf32, #tpu.memory_space<vmem>>, vector<16x32xf32>
    %cst_25 = arith.constant dense<0.000000e+00> : vector<8x32xf32>
    %36 = tpu.matmul %34, %35, %cst_25 {dimension_numbers = #tpu.dot_dimension_numbers<[1], [0], [0], [1], [0, 0, 1, 1], [], []>} : vector<8x16xf32>, vector<16x32xf32>, vector<8x32xf32> -> vector<8x32xf32>
    %37 = arith.addf %4, %36 : vector<8x32xf32>
    %38 = vector.extract_strided_slice %10 {offsets = [0, 16], sizes = [8, 16], strides = [1, 1]} : vector<8x32xf32> to vector<8x16xf32>
    %c0_26 = arith.constant 0 : index
    %c16 = arith.constant 16 : index
    %39 = vector.load %arg14[%c0_26, %c16] : memref<8x32xf32, #tpu.memory_space<vmem>>, vector<8x16xf32>
    %c0_27 = arith.constant 0 : index
    %c16_28 = arith.constant 16 : index
    %40 = vector.load %arg15[%c0_27, %c16_28] : memref<8x32xf32, #tpu.memory_space<vmem>>, vector<8x16xf32>
    %cst_29 = arith.constant dense<0.000000e+00> : vector<8x8xf32>
    %41 = tpu.matmul %38, %39, %cst_29 {dimension_numbers = #tpu.dot_dimension_numbers<[1], [1], [0], [0], [0, 0, 1, 0], [], []>} : vector<8x16xf32>, vector<8x16xf32>, vector<8x8xf32> -> vector<8x8xf32>
    %c0_i32_30 = arith.constant 0 : i32
    %42 = vector.broadcast %c0_i32_30 : i32 to vector<1x8xi32>
    %43 = arith.cmpi ne, %6, %42 : vector<1x8xi32>
    %cst_31 = arith.constant 0xFF800000 : f32
    %44 = vector.shape_cast %43 : vector<1x8xi1> to vector<1x8xi1>
    %45 = vector.broadcast %44 : vector<1x8xi1> to vector<8x8xi1>
    %46 = vector.broadcast %cst_31 : f32 to vector<8x8xf32>
    %47 = arith.select %45, %46, %41 : vector<8x8xi1>, vector<8x8xf32>
    %cst_32 = arith.constant dense<0xFF800000> : vector<8xf32>
    %48 = vector.multi_reduction <maximumf>, %47, %cst_32 [1] : vector<8x8xf32> to vector<8xf32>
    %49 = vector.shape_cast %48 : vector<8xf32> to vector<8x1xf32>
    %50 = vector.broadcast %49 : vector<8x1xf32> to vector<8x8xf32>
    %51 = arith.subf %47, %50 : vector<8x8xf32>
    %52 = math.exp %51 : vector<8x8xf32>
    %cst_33 = arith.constant dense<0.000000e+00> : vector<8xf32>
    %53 = vector.multi_reduction <add>, %52, %cst_33 [1] : vector<8x8xf32> to vector<8xf32>
    %54 = vector.shape_cast %53 : vector<8xf32> to vector<8x1xf32>
    %55 = tpu.reciprocal %54 : vector<8x1xf32> -> vector<8x1xf32>
    %56 = vector.broadcast %55 : vector<8x1xf32> to vector<8x8xf32>
    %57 = arith.mulf %52, %56 : vector<8x8xf32>
    %c1 = arith.constant 1 : index
    %c0_34 = arith.constant 0 : index
    %c0_35 = arith.constant 0 : index
    %c0_36 = arith.constant 0 : index
    %58 = vector.load %arg13[%c1, %c0_34, %c0_35, %c0_36] : memref<2x1x8x8xf32, #tpu.memory_space<vmem>>, vector<1x1x8x8xf32>
    %59 = vector.shape_cast %58 : vector<1x1x8x8xf32> to vector<8x8xf32>
    %60 = vector.shape_cast %57 : vector<8x8xf32> to vector<1x1x8x8xf32>
    tpu.vector_store %arg13[%c1, %c0_34, %c0_35, %c0_36], %60 {strides = array<i32>} : memref<2x1x8x8xf32, #tpu.memory_space<vmem>>, vector<1x1x8x8xf32>,
    %cst_37 = arith.constant dense<0.000000e+00> : vector<8x16xf32>
    %61 = tpu.matmul %57, %40, %cst_37 {dimension_numbers = #tpu.dot_dimension_numbers<[1], [0], [0], [1], [0, 0, 1, 1], [], []>} : vector<8x8xf32>, vector<8x16xf32>, vector<8x16xf32> -> vector<8x16xf32>
    %c16_38 = arith.constant 16 : index
    %c0_39 = arith.constant 0 : index
    %62 = vector.load %arg9[%c16_38, %c0_39] : memref<32x32xf32, #tpu.memory_space<vmem>>, vector<16x32xf32>
    %cst_40 = arith.constant dense<0.000000e+00> : vector<8x32xf32>
    %63 = tpu.matmul %61, %62, %cst_40 {dimension_numbers = #tpu.dot_dimension_numbers<[1], [0], [0], [1], [0, 0, 1, 1], [], []>} : vector<8x16xf32>, vector<16x32xf32>, vector<8x32xf32> -> vector<8x32xf32>
    %64 = arith.addf %37, %63 : vector<8x32xf32>
    %cst_41 = arith.constant dense<0.000000e+00> : vector<8xf32>
    %65 = vector.multi_reduction <add>, %64, %cst_41 [1] : vector<8x32xf32> to vector<8xf32>
    %66 = vector.shape_cast %65 : vector<8xf32> to vector<8x1xf32>
    %cst_42 = arith.constant 3.200000e+01 : f32
    %67 = vector.broadcast %cst_42 : f32 to vector<8x1xf32>
    %68 = arith.divf %66, %67 : vector<8x1xf32>
    %69 = vector.broadcast %68 : vector<8x1xf32> to vector<8x32xf32>
    %70 = arith.subf %64, %69 : vector<8x32xf32>
    %71 = arith.mulf %70, %70 : vector<8x32xf32>
    %cst_43 = arith.constant dense<0.000000e+00> : vector<8xf32>
    %72 = vector.multi_reduction <add>, %71, %cst_43 [1] : vector<8x32xf32> to vector<8xf32>
    %73 = vector.shape_cast %72 : vector<8xf32> to vector<8x1xf32>
    %cst_44 = arith.constant 3.200000e+01 : f32
    %74 = vector.broadcast %cst_44 : f32 to vector<8x1xf32>
    %75 = arith.divf %73, %74 : vector<8x1xf32>
    %76 = vector.broadcast %68 : vector<8x1xf32> to vector<8x32xf32>
    %77 = arith.subf %64, %76 : vector<8x32xf32>
    %cst_45 = arith.constant 9.99999974E-6 : f32
    %78 = vector.broadcast %cst_45 : f32 to vector<8x1xf32>
    %79 = arith.addf %75, %78 : vector<8x1xf32>
    %80 = math.rsqrt %79 : vector<8x1xf32>
    %81 = vector.broadcast %80 : vector<8x1xf32> to vector<8x32xf32>
    %82 = arith.mulf %77, %81 : vector<8x32xf32>
    %c0_46 = arith.constant 0 : index
    %c0_47 = arith.constant 0 : index
    %83 = vector.load %arg10[%c0_46, %c0_47] : memref<1x32xf32, #tpu.memory_space<vmem>>, vector<1x32xf32>
    %84 = vector.broadcast %83 : vector<1x32xf32> to vector<8x32xf32>
    %85 = arith.mulf %82, %84 : vector<8x32xf32>
    %c0_48 = arith.constant 0 : index
    %c0_49 = arith.constant 0 : index
    %86 = vector.load %arg11[%c0_48, %c0_49] : memref<1x32xf32, #tpu.memory_space<vmem>>, vector<1x32xf32>
    %87 = vector.broadcast %86 : vector<1x32xf32> to vector<8x32xf32>
    %88 = arith.addf %85, %87 : vector<8x32xf32>
    %c0_50 = arith.constant 0 : index
    %c0_51 = arith.constant 0 : index
    %c0_52 = arith.constant 0 : index
    %89 = vector.load %arg12[%c0_50, %c0_51, %c0_52] : memref<1x8x32xf32, #tpu.memory_space<vmem>>, vector<1x8x32xf32>
    %90 = vector.shape_cast %89 : vector<1x8x32xf32> to vector<8x32xf32>
    %91 = vector.shape_cast %88 : vector<8x32xf32> to vector<1x8x32xf32>
    tpu.vector_store %arg12[%c0_50, %c0_51, %c0_52], %91 {strides = array<i32>} : memref<1x8x32xf32, #tpu.memory_space<vmem>>, vector<1x8x32xf32>,
    return
  }
  func.func @transform_0(%arg0: i32, %arg1: i32) -> (i32, i32, i32) {
    %c0_i32 = arith.constant 0 : i32
    %c0_i32_0 = arith.constant 0 : i32
    return %arg0, %arg1, %c0_i32 : i32, i32, i32
  }
  func.func @transform_1(%arg0: i32, %arg1: i32) -> (i32, i32, i32) {
    %c0_i32 = arith.constant 0 : i32
    %c0_i32_0 = arith.constant 0 : i32
    %c0_i32_1 = arith.constant 0 : i32
    return %arg0, %c0_i32, %c0_i32_0 : i32, i32, i32
  }
  func.func @transform_2(%arg0: i32, %arg1: i32) -> (i32, i32, i32) {
    %c0_i32 = arith.constant 0 : i32
    %c0_i32_0 = arith.constant 0 : i32
    %c0_i32_1 = arith.constant 0 : i32
    return %arg0, %c0_i32, %c0_i32_0 : i32, i32, i32
  }
  func.func @transform_3(%arg0: i32, %arg1: i32) -> (i32, i32, i32) {
    %c0_i32 = arith.constant 0 : i32
    %c0_i32_0 = arith.constant 0 : i32
    %c0_i32_1 = arith.constant 0 : i32
    return %arg0, %c0_i32, %c0_i32_0 : i32, i32, i32
  }
  func.func @transform_4(%arg0: i32, %arg1: i32) -> (i32, i32) {
    %c0_i32 = arith.constant 0 : i32
    %c0_i32_0 = arith.constant 0 : i32
    %c0_i32_1 = arith.constant 0 : i32
    return %c0_i32, %c0_i32_0 : i32, i32
  }
  func.func @transform_5(%arg0: i32, %arg1: i32) -> (i32, i32) {
    %c0_i32 = arith.constant 0 : i32
    %c0_i32_0 = arith.constant 0 : i32
    %c0_i32_1 = arith.constant 0 : i32
    return %c0_i32, %c0_i32_0 : i32, i32
  }
  func.func @transform_6(%arg0: i32, %arg1: i32) -> (i32, i32) {
    %c0_i32 = arith.constant 0 : i32
    %c0_i32_0 = arith.constant 0 : i32
    %c0_i32_1 = arith.constant 0 : i32
    return %c0_i32, %c0_i32_0 : i32, i32
  }
  func.func @transform_7(%arg0: i32, %arg1: i32) -> (i32, i32) {
    %c0_i32 = arith.constant 0 : i32
    %c0_i32_0 = arith.constant 0 : i32
    %c0_i32_1 = arith.constant 0 : i32
    return %c0_i32, %c0_i32_0 : i32, i32
  }
  func.func @transform_8(%arg0: i32, %arg1: i32) -> (i32, i32) {
    %c0_i32 = arith.constant 0 : i32
    %c0_i32_0 = arith.constant 0 : i32
    %c0_i32_1 = arith.constant 0 : i32
    return %c0_i32, %c0_i32_0 : i32, i32
  }
  func.func @transform_9(%arg0: i32, %arg1: i32) -> (i32, i32) {
    %c0_i32 = arith.constant 0 : i32
    %c0_i32_0 = arith.constant 0 : i32
    %c0_i32_1 = arith.constant 0 : i32
    return %c0_i32, %c0_i32_0 : i32, i32
  }
  func.func @transform_10(%arg0: i32, %arg1: i32) -> (i32, i32, i32) {
    %c0_i32 = arith.constant 0 : i32
    %c0_i32_0 = arith.constant 0 : i32
    return %arg0, %arg1, %c0_i32 : i32, i32, i32
  }
  func.func @transform_11(%arg0: i32, %arg1: i32) -> (i32, i32, i32, i32) {
    %c0_i32 = arith.constant 0 : i32
    %c0_i32_0 = arith.constant 0 : i32
    %c0_i32_1 = arith.constant 0 : i32
    return %c0_i32, %arg0, %arg1, %c0_i32_0 : i32, i32, i32, i32
  }
}

</mosaic_0001>

<bundles_post_ra>
// kernel: tpu_custom_call.1
= control target key start
LH: loop header
LB: loop body
LE: loop exit
PB: predicated region body
PF: predicated region fallthrough
CT: control target
= control target key end

     0   :  { %s2798_s0 = inlined_call_operand.hbm [shape: f32[2,8,32], index: 0, kind: input, shape index: {}]   ;;  %s2799_s1 = inlined_call_operand.hbm [shape: f32[2,8,32], index: 1, kind: input, shape index: {}]   ;;  %s2800_s2 = inlined_call_operand.hbm [shape: f32[2,8,32], index: 2, kind: input, shape index: {}]   ;;  %s2801_s3 = inlined_call_operand.vmem [shape: s32[2,1,8], index: 3, kind: input, shape index: {}]   ;;  %s2802_s4 = inlined_call_operand.hbm [shape: f32[32,32], index: 4, kind: input, shape index: {}]   ;;  %s2803_s5 = inlined_call_operand.hbm [shape: f32[32,32], index: 5, kind: input, shape index: {}]   ;;  %s2804_s6 = inlined_call_operand.hbm [shape: f32[32,32], index: 6, kind: input, shape index: {}]   ;;  %s2805_s7 = inlined_call_operand.hbm [shape: f32[32,32], index: 7, kind: input, shape index: {}]   ;;  %s2806_s8 = inlined_call_operand.vmem [shape: f32[1,32], index: 8, kind: input, shape index: {}]   ;;  %s2807_s9 = inlined_call_operand.vmem [shape: f32[1,32], index: 9, kind: input, shape index: {}]   ;;  %s2808_s10 = inlined_call_operand.hbm [shape: f32[2,8,32], index: 10, kind: output, shape index: {0}]   ;;  %s2809_s11 = inlined_call_operand.hbm [shape: f32[2,2,8,8], index: 11, kind: output, shape index: {1}]  }
   0x1   :  { %2837 = sst [smem:[#allocation32_spill]] %s2799_s1 }
   0x2   :  { %2838 = sst [smem:[#allocation33_spill]] %s2802_s4 }
   0x3   :  { %2839 = sst [smem:[#allocation34_spill]] %s2804_s6 }
   0x4   :  { %2840 = sst [smem:[#allocation35_spill]] %s2806_s8 }
   0x5   :  { %2841 = sst [smem:[#allocation36_spill]] %s2807_s9 }
   0x6   :  { %2842 = sst [smem:[#allocation37_spill]] %s2808_s10 }
   0x7   :  { %2843 = sst [smem:[#allocation38_spill]] %s2809_s11 }
   0x8   :  { %17 = vsyncpa [#allocation5], 0 }
   0x9   :  { %19 = vsyncpa [#allocation5 + $0x1], 0 }
   0xa   :  { %20 = vsyncpa [#allocation8], 0 }
   0xb   :  { %22 = vsyncpa [#allocation8 + $0x1], 0 }
   0xc   :  { %23 = vsyncpa [#allocation11], 0 }
   0xd   :  { %24 = vsyncpa [#allocation14], 0 }
   0xe   :  { %25 = vsyncpa [#allocation6], 0 }
   0xf   :  { %27 = vsyncpa [#allocation6 + $0x1], 0 }
  0x10   :  { %28 = vsyncpa [#allocation18], 0 }
  0x11   :  { %30 = vsyncpa [#allocation18 + $0x1], 0  ;;  %s2299_s17 = smov 0   ;;  %s2301_s18 = smov 0  }
  0x12   :  { %s2303_s19 = smov 0   ;;  %s2305_s20 = smov 0  }
  0x13   :  { %s2307_s21 = smov 0   ;;  %s2309_s22 = smov 0  }
  0x14 LB: > { %2844 = sst [smem:[#allocation25_spill]] %s2198_s17  ;;  %s2330_s23 = sadd.s32 4294967295, %s2218_s22   ;;  %s2218_s22 = sphi %s2309_s22, %s36_s22   ;;  %s2214_s21 = sphi %s2307_s21, %s2890_s21   ;;  %s2210_s20 = sphi %s2305_s20, %s2889_s20   ;;  %s2206_s19 = sphi %s2303_s19, %s2893_s19   ;;  %s2202_s18 = sphi %s2301_s18, %s2892_s18   ;;  %s2198_s17 = sphi %s2299_s17, %s2891_s17  }
  0x15   : > { %2845 = sst [smem:[#allocation26_spill]] %s2214_s21  ;;  %p1588_p0 = scmp.ge.s32.totalorder %s2218_s22, 1 }
  0x16   : > { %2846 = sst [smem:[#allocation27_spill]] %s2218_s22  ;;  %p2821_p1 = scmp.eq.s32.totalorder %s2330_s23, 0 }
  0x17   : > { %p341_p2 = scmp.lt.s32.totalorder %s2218_s22, 3  ;;  %s2220_s25 = smov [#allocation10]  }
  0x18   : > { %s353_s26 = sshll.u32 %s2220_s25, 4  ;;  %s2221_s28 = smov [#allocation13]   ;;  %s2339_s26 = int_to_ptr.vmem [resolvable:$true] %s353_s26 }
  0x19   : > { %p2335_p3 = pnand %p1588_p0, %p341_p2  ;;  %s379_s29 = sshll.u32 %s2221_s28, 4  ;;  %s2350_s29 = int_to_ptr.vmem [resolvable:$true] %s379_s29 }
  0x1a   : > { %s2849_s4 = sld [smem:[#allocation33_spill]] }
  0x1b   : > { %s2847_s24 = scalar_select %p2335_p3, 1, 0 }
  0x1c   : > { %p1778_p4 = pneg %p2335_p3 }
  0x1e   : > { %p2346_p6 = pnand %p1778_p4, %p2821_p1 }
  0x20   : > { %s2848_s27 = scalar_select %p2346_p6, 1, 0 }
  0x21   : > { %s1890_s13 = scalar_lea.hbm %s2849_s4, 512  ;;  %p2360_p8 = pneg %p2346_p6 }
  0x22   : > { %p1891_p7 = scmp.ne.s32.totalorder %s2849_s4, %s1890_s13  ;;  %p1897_p11 = scmp.lt.u32.totalorder %s1890_s13, %s2849_s4 }
  0x23   : > { %s2850_s16 = scalar_select %p2360_p8, 1, 0 }
  0x24   : > { %p1893_p9 = pnand %p2360_p8, %p1891_p7 }
  0x26   : > { %p1894_p10 = pneg %p1893_p9 }
  0x28   : > { %p1899_p12 = pnand %p1897_p11, %p1894_p10 }
  0x2a   : > { %1902 = shalt.err (!%p1899_p12)
}
  0x2b   : > { %s1903_s30 = scalar_lea.vmem %s2339_s26, 512  ;;  %p1911_p4 = scmp.lt.s32.totalorder %s2339_s26, %s2339_s26 }
  0x2c   : > { %p1904_p13 = scmp.ne.s32.totalorder %s2339_s26, %s1903_s30  ;;  %p1912_p5 = scmp.lt.s32.totalorder %s1903_s30, %s1903_s30 }
  0x2e   : > { %p1906_p0 = pnand %p1904_p13, %p2360_p8  ;;  %p1913_p7 = por %p1912_p5, %p1911_p4 }
  0x30   : > { %p1907_p2 = pneg %p1906_p0 }
  0x32   : > { %p1914_p9 = pnand %p1913_p7, %p1907_p2 }
  0x34   : > { %1917 = shalt.err (!%p1914_p9)
}
  0x35   : > { %s2812_s12 = smov 128   ;;  %s2814_s13 = smov 8  }
  0x36   : > { %1781 = dma.hbm_to_vmem [thread:$0]  (!%p2346_p6), %s2849_s4, 512, %s2339_s26, [#allocation11], %s2812_s12, %s2812_s12, %s2814_s13  }
  0x37   : > { %s2851_s6 = sld [smem:[#allocation34_spill]] }
  0x3d   : > { %s1918_s30 = scalar_lea.hbm %s2851_s6, 512 }
  0x3e   : > { %p1919_p5 = scmp.ne.s32.totalorder %s2851_s6, %s1918_s30  ;;  %p1925_p12 = scmp.lt.u32.totalorder %s1918_s30, %s2851_s6 }
  0x40   : > { %p1921_p10 = pnand %p1919_p5, %p2360_p8 }
  0x42   : > { %p1922_p11 = pneg %p1921_p10 }
  0x44   : > { %p1927_p13 = pnand %p1925_p12, %p1922_p11 }
  0x46   : > { %1930 = shalt.err (!%p1927_p13)
}
  0x47   : > { %s1931_s26 = scalar_lea.vmem %s2350_s29, 512  ;;  %p1939_p7 = scmp.lt.s32.totalorder %s2350_s29, %s2350_s29 }
  0x48   : > { %p1932_p0 = scmp.ne.s32.totalorder %s2350_s29, %s1931_s26  ;;  %p1940_p9 = scmp.lt.s32.totalorder %s1931_s26, %s1931_s26 }
  0x4a   : > { %p1934_p2 = pnand %p1932_p0, %p2360_p8  ;;  %p1941_p5 = por %p1940_p9, %p1939_p7 }
  0x4c   : > { %p1935_p4 = pneg %p1934_p2 }
  0x4e   : > { %p1942_p10 = pnand %p1941_p5, %p1935_p4 }
  0x50   : > { %1945 = shalt.err (!%p1942_p10)
}
  0x51   : > { %1787 = dma.hbm_to_vmem [thread:$0]  (!%p2346_p6), %s2851_s6, 512, %s2350_s29, [#allocation14], %s2812_s12, %s2812_s12, %s2814_s13  }
  0x52   : > { %s1587_s10 = sadd.s32 4294967294, %s2218_s22   ;;  %s48_s11 = sadd.s32 1, %s2214_s21 }
  0x53   : > { %p50_p11 = scmp.ge.s32.totalorder %s48_s11, 2  ;;  %s57_s14 = sadd.s32 1, %s2206_s19 }
  0x54   : > { %p64_p12 = scmp.ne.s32.totalorder %s2206_s19, %s2202_s18  ;;  %p65_p13 = scmp.eq.s32.totalorder %s2218_s22, 0 }
  0x55   : > { %s2895_s11 = smov (%p50_p11, %s48_s11), 0  ;;  %p70_p2 = scmp.ne.s32.totalorder %s2202_s18, %s2198_s17 }
  0x56   : > { %2852 = sst [smem:[#allocation28_spill]] %s2895_s11  ;;  %p2418_p0 = por %p65_p13, %p64_p12 }
  0x57   : > { %s52_s29 = ssub.s32 %s2214_s21, %s2895_s11  ;;  %p300_p4 = scmp.eq.s32.totalorder %s2330_s23, 1 }
  0x58   : > { %p55_p7 = scmp.eq.s32.totalorder %s52_s29, 0  ;;  %p2429_p9 = por %p2821_p1, %p70_p2 }
  0x59   : > { %p2433_p5 = por %p300_p4, %p64_p12  ;;  %p306_p10 = scmp.eq.s32.totalorder %s1587_s10, 1 }
  0x5a   : > { %s2854_s25 = scalar_select %p2429_p9, 1, 0 }
  0x5b   : > { %s2855_s28 = scalar_select %p2433_p5, 1, 0 }
  0x5c   : > { %s2438_s30 = scalar_select %p55_p7, %s2206_s19, %s57_s14  }
  0x5d   : > { %2856 = sst [smem:[#allocation29_spill]] %s2855_s28  ;;  %p2440_p11 = por %p306_p10, %p70_p2 }
  0x5e   : > { %2857 = sst [smem:[#allocation30_spill]] %s2438_s30  ;;  %p1812_p13 = scmp.lt.s32.totalorder %s2218_s22, 2 }
  0x5f   : > { %s2858_s26 = scalar_select %p2440_p11, 1, 0 }
  0x60   : > { %s2816_s8 = sand.u32 1, %s2206_s19   ;;  %s2447_s9 = sshll.u32 %s2214_s21, 7 }
  0x61   : > { %2859 = sst [smem:[#allocation31_spill]] %s2858_s26  ;;  %s2451_s29 = sshll.u32 %s2816_s8, 3 }
  0x62   : > { %p2455_p12 = pnand %p1812_p13, %p2418_p0  ;;  %s431_s10 = sand.u32 1, %s2218_s22  }
  0x63   : > { %s2861_s1 = sld [smem:[#allocation32_spill]]  ;;  %s435_s6 = scalar_lea.vmem [#allocation7], %s2451_s29 }
  0x64   : > { %s2860_s12 = scalar_select %p2455_p12, 1, 0 }
  0x65   : > { %s442_s8 = sshll.u32 %s435_s6, 4  ;;  %s2469_s15 = scalar_lea.sflag [#allocation8], %s431_s10  ;;  %s2467_s8 = int_to_ptr.vmem [resolvable:$true] %s442_s8 }
  0x66   : > { %p2475_p2 = pneg %p2455_p12 }
  0x68   : > { %s2862_s21 = scalar_select %p2475_p2, 1, 0 }
  0x69   : > { %s2464_s4 = scalar_lea.hbm %s2861_s1, %s2447_s9  ;;  %s1951_s30 = scalar_lea.hbm %s2861_s1, 256 }
  0x6a   : > { %s1946_s11 = scalar_lea.hbm %s2464_s4, 128  ;;  %p1952_p10 = scmp.lt.u32.totalorder %s2464_s4, %s2861_s1 }
  0x6b   : > { %p1947_p0 = scmp.ne.s32.totalorder %s2464_s4, %s1946_s11  ;;  %p1953_p13 = scmp.lt.u32.totalorder %s1951_s30, %s1946_s11 }
  0x6c   : > { %p1955_p11 = scmp.lt.u32.totalorder %s1946_s11, %s2464_s4 }
  0x6d   : > { %p1949_p4 = pnand %p2475_p2, %p1947_p0  ;;  %p1954_p1 = por %p1953_p13, %p1952_p10 }
  0x6f   : > { %p1950_p7 = pneg %p1949_p4  ;;  %p1956_p5 = por %p1955_p11, %p1954_p1 }
  0x71   : > { %p1957_p9 = pnand %p1956_p5, %p1950_p7 }
  0x73   : > { %1960 = shalt.err (!%p1957_p9)
}
  0x74   : > { %s1961_s10 = scalar_lea.vmem %s2467_s8, 128  ;;  %s2224_s13 = smov [#allocation7]  }
  0x75   : > { %p1962_p0 = scmp.ne.s32.totalorder %s2467_s8, %s1961_s10  ;;  %s1966_s14 = sshll.u32 %s2224_s13, 4  ;;  %s1967_s14 = int_to_ptr.vmem [resolvable:$false] %s1966_s14 }
  0x76   : > { %s1968_s22 = scalar_lea.vmem %s1967_s14, 256  ;;  %p1969_p6 = scmp.lt.s32.totalorder %s2467_s8, %s1967_s14 }
  0x77   : > { %p1964_p4 = pnand %p1962_p0, %p2475_p2  ;;  %p1970_p8 = scmp.lt.s32.totalorder %s1968_s22, %s1961_s10 }
  0x79   : > { %p1965_p3 = pneg %p1964_p4  ;;  %p1971_p10 = por %p1970_p8, %p1969_p6 }
  0x7b   : > { %p1972_p13 = pnand %p1971_p10, %p1965_p3 }
  0x7d   : > { %1975 = shalt.err (!%p1972_p13)
}
  0x7e   : > { %1797 = dma.hbm_to_vmem [thread:$0]  (!%p2455_p12), %s2464_s4, 128, %s2467_s8, %s2469_s15  }
  0x7f   : > { %s2225_s11 = smov [#allocation12]   ;;  %s2226_s6 = smov [#allocation15]  }
  0x80   : > { %s366_s30 = sshll.u32 %s2225_s11, 4  ;;  %s392_s1 = sshll.u32 %s2226_s6, 4  ;;  %s367_s30 = int_to_ptr.vmem [resolvable:$true] %s366_s30  ;;  %s393_s1 = int_to_ptr.vmem [resolvable:$true] %s392_s1 }
  0x81   : > { %s1976_s14 = scalar_lea.hbm %s2803_s5, 512  ;;  %p2863_p3 = scmp.ne.s32.totalorder %s2850_s16, 0 }
  0x82   : > { %p1977_p1 = scmp.ne.s32.totalorder %s2803_s5, %s1976_s14  ;;  %p1983_p9 = scmp.lt.u32.totalorder %s1976_s14, %s2803_s5 }
  0x84   : > { %p1979_p6 = pnand %p1977_p1, %p2863_p3 }
  0x86   : > { %p1980_p8 = pneg %p1979_p6 }
  0x88   : > { %p1985_p5 = pnand %p1983_p9, %p1980_p8 }
  0x8a   : > { %1988 = shalt.err (!%p1985_p5)
}
  0x8b   : > { %s1989_s4 = scalar_lea.vmem %s367_s30, 512  ;;  %p1997_p4 = scmp.lt.s32.totalorder %s367_s30, %s367_s30 }
  0x8c   : > { %p1990_p11 = scmp.ne.s32.totalorder %s367_s30, %s1989_s4  ;;  %p1998_p10 = scmp.lt.s32.totalorder %s1989_s4, %s1989_s4 }
  0x8e   : > { %p1992_p7 = pnand %p1990_p11, %p2863_p3  ;;  %p1999_p13 = por %p1998_p10, %p1997_p4 }
  0x90   : > { %p1993_p0 = pneg %p1992_p7 }
  0x92   : > { %p2000_p12 = pnand %p1999_p13, %p1993_p0 }
  0x94   : > { %2003 = shalt.err (!%p2000_p12)
}
  0x95   : > { %p2864_p1 = scmp.ne.s32.totalorder %s2848_s27, 0  ;;  %s2865_s26 = smov 8  }
  0x96   : > { %s2866_s8 = smov 128   ;;  %s2004_s13 = scalar_lea.hbm %s2805_s7, 512 }
  0x97   : > { %1784 = dma.hbm_to_vmem [thread:$0]  (!%p2864_p1), %s2803_s5, 512, %s367_s30, [#allocation11], %s2866_s8, %s2866_s8, %s2865_s26  }
  0x98   : > { %p2005_p6 = scmp.ne.s32.totalorder %s2805_s7, %s2004_s13  ;;  %p2011_p9 = scmp.lt.u32.totalorder %s2004_s13, %s2805_s7 }
  0x9a   : > { %p2007_p12 = pnand %p2005_p6, %p2863_p3 }
  0x9c   : > { %p2008_p8 = pneg %p2007_p12 }
  0x9e   : > { %p2013_p5 = pnand %p2011_p9, %p2008_p8 }
  0xa0   : > { %2016 = shalt.err (!%p2013_p5)
}
  0xa1   : > { %s2017_s17 = scalar_lea.vmem %s393_s1, 512  ;;  %p2025_p4 = scmp.lt.s32.totalorder %s393_s1, %s393_s1 }
  0xa2   : > { %p2018_p11 = scmp.ne.s32.totalorder %s393_s1, %s2017_s17  ;;  %p2026_p10 = scmp.lt.s32.totalorder %s2017_s17, %s2017_s17 }
  0xa4   : > { %p2020_p7 = pnand %p2018_p11, %p2863_p3  ;;  %p2027_p13 = por %p2026_p10, %p2025_p4 }
  0xa6   : > { %p2021_p0 = pneg %p2020_p7 }
  0xa8   : > { %p2028_p2 = pnand %p2027_p13, %p2021_p0 }
  0xaa   : > { %2031 = shalt.err (!%p2028_p2)
}
  0xab   : > { %1790 = dma.hbm_to_vmem [thread:$0]  (!%p2864_p1), %s2805_s7, 512, %s393_s1, [#allocation14], %s2866_s8, %s2866_s8, %s2865_s26  }
  0xac   : > { %s2545_s6 = scalar_lea.hbm %s2798_s0, %s2447_s9  ;;  %s416_s27 = scalar_lea.vmem [#allocation4], %s2451_s29 }
  0xad   : > { %s424_s13 = sshll.u32 %s416_s27, 4  ;;  %s2554_s22 = scalar_lea.hbm %s2800_s2, %s2447_s9  ;;  %s2548_s13 = int_to_ptr.vmem [resolvable:$true] %s424_s13 }
  0xae   : > { %s2867_s4 = sand.u32 1, %s2206_s19   ;;  %s2032_s26 = scalar_lea.hbm %s2545_s6, 128 }
  0xaf   : > { %s413_s1 = scalar_lea.sflag [#allocation5], %s2867_s4  ;;  %p2033_p2 = scmp.ne.s32.totalorder %s2545_s6, %s2032_s26 }
  0xb0   : > { %p2868_p3 = scmp.ne.s32.totalorder %s2862_s21, 0  ;;  %s2037_s30 = scalar_lea.hbm %s2798_s0, 256 }
  0xb1   : > { %p2038_p12 = scmp.lt.u32.totalorder %s2545_s6, %s2798_s0  ;;  %p2039_p8 = scmp.lt.u32.totalorder %s2037_s30, %s2032_s26 }
  0xb2   : > { %p2035_p1 = pnand %p2033_p2, %p2868_p3  ;;  %p2041_p5 = scmp.lt.u32.totalorder %s2032_s26, %s2545_s6 }
  0xb3   : > { %p2040_p9 = por %p2039_p8, %p2038_p12 }
  0xb4   : > { %p2036_p6 = pneg %p2035_p1 }
  0xb5   : > { %p2042_p11 = por %p2041_p5, %p2040_p9 }
  0xb7   : > { %p2043_p7 = pnand %p2042_p11, %p2036_p6 }
  0xb9   : > { %2046 = shalt.err (!%p2043_p7)
}
  0xba   : > { %s2047_s9 = scalar_lea.vmem %s2548_s13, 128  ;;  %s2227_s11 = smov [#allocation4]  }
  0xbb   : > { %p2048_p0 = scmp.ne.s32.totalorder %s2548_s13, %s2047_s9  ;;  %s2052_s27 = sshll.u32 %s2227_s11, 4  ;;  %s2053_s27 = int_to_ptr.vmem [resolvable:$false] %s2052_s27 }
  0xbc   : > { %s2054_s14 = scalar_lea.vmem %s2053_s27, 256  ;;  %p2055_p13 = scmp.lt.s32.totalorder %s2548_s13, %s2053_s27 }
  0xbd   : > { %p2050_p4 = pnand %p2048_p0, %p2868_p3  ;;  %p2056_p2 = scmp.lt.s32.totalorder %s2054_s14, %s2047_s9 }
  0xbf   : > { %p2051_p10 = pneg %p2050_p4  ;;  %p2057_p1 = por %p2056_p2, %p2055_p13 }
  0xc1   : > { %p2058_p12 = pnand %p2057_p1, %p2051_p10 }
  0xc3   : > { %2061 = shalt.err (!%p2058_p12)
}
  0xc4   : > { %p2869_p6 = scmp.ne.s32.totalorder %s2860_s12, 0  ;;  %s453_s10 = scalar_lea.vmem [#allocation9], %s2451_s29 }
  0xc5   : > { %s460_s4 = sshll.u32 %s453_s10, 4  ;;  %s2062_s26 = scalar_lea.hbm %s2554_s22, 128  ;;  %s461_s4 = int_to_ptr.vmem [resolvable:$true] %s460_s4 }
  0xc6   : > { %1794 = dma.hbm_to_vmem [thread:$0]  (!%p2869_p6), %s2545_s6, 128, %s2548_s13, %s413_s1  }
  0xc7   : > { %p2063_p8 = scmp.ne.s32.totalorder %s2554_s22, %s2062_s26  ;;  %s2067_s30 = scalar_lea.hbm %s2800_s2, 256 }
  0xc8   : > { %p2068_p11 = scmp.lt.u32.totalorder %s2554_s22, %s2800_s2  ;;  %p2069_p7 = scmp.lt.u32.totalorder %s2067_s30, %s2062_s26 }
  0xc9   : > { %p2065_p9 = pnand %p2063_p8, %p2868_p3  ;;  %p2071_p4 = scmp.lt.u32.totalorder %s2062_s26, %s2554_s22 }
  0xca   : > { %p2070_p0 = por %p2069_p7, %p2068_p11 }
  0xcb   : > { %p2066_p5 = pneg %p2065_p9 }
  0xcc   : > { %p2072_p10 = por %p2071_p4, %p2070_p0 }
  0xce   : > { %p2073_p13 = pnand %p2072_p10, %p2066_p5 }
  0xd0   : > { %2076 = shalt.err (!%p2073_p13)
}
  0xd1   : > { %s2077_s29 = scalar_lea.vmem %s461_s4, 128  ;;  %s2228_s6 = smov [#allocation9]  }
  0xd2   : > { %p2078_p2 = scmp.ne.s32.totalorder %s461_s4, %s2077_s29  ;;  %s2082_s13 = sshll.u32 %s2228_s6, 4  ;;  %s2083_s13 = int_to_ptr.vmem [resolvable:$false] %s2082_s13 }
  0xd3   : > { %s2084_s1 = scalar_lea.vmem %s2083_s13, 256  ;;  %p2085_p8 = scmp.lt.s32.totalorder %s461_s4, %s2083_s13 }
  0xd4   : > { %p2080_p1 = pnand %p2078_p2, %p2868_p3  ;;  %p2086_p9 = scmp.lt.s32.totalorder %s2084_s1, %s2077_s29 }
  0xd6   : > { %p2081_p12 = pneg %p2080_p1  ;;  %p2087_p6 = por %p2086_p9, %p2085_p8 }
  0xd8   : > { %p2088_p7 = pnand %p2087_p6, %p2081_p12 }
  0xda   : > { %2091 = shalt.err (!%p2088_p7)
}
  0xdb   : > { %p2870_p11 = scmp.ne.s32.totalorder %s2860_s12, 0  ;;  %p2871_p5 = scmp.ne.s32.totalorder %s2847_s24, 0 }
  0xdc   : > { %s2601_s21 = sand.u32 (!%p2871_p5), 1, %s2202_s18   ;;  %p2872_p3 = scmp.ne.s32.totalorder (!%p2871_p5), %s2854_s25, 0 }
  0xdd   : > { %1800 = dma.hbm_to_vmem [thread:$0]  (!%p2870_p11), %s2554_s22, 128, %s461_s4, %s2469_s15  }
  0xde   : > { %475 = sbr.rel (%p2871_p5) target bundleno = 2497 (0x9c1), region = 60  ;;  %s2604_s9 = sshll.u32 (!%p2871_p5), %s2601_s21, 3 }
  0xdf   : > { %s478_s11 = scalar_lea.sflag (!%p2871_p5), [#allocation5], %s2601_s21  ;;  %s481_s27 = scalar_lea.vmem (!%p2871_p5), [#allocation4], %s2604_s9 }
  0xe5   : > { %2173 = dma.done.wait (%p2872_p3), %s478_s11, 128  }
  0xe6   : > { %2175 = vsyncadd (%p2872_p3), %s478_s11, 4294967168  ;;  %s486_s24 = sand.u32 1, %s2330_s23   ;;  %s490_s15 = scalar_lea.vmem [#allocation7], %s2604_s9 }
  0xe7   : > { %s487_s12 = scalar_lea.sflag [#allocation8], %s486_s24 }
  0xe8   : > { %2177 = dma.done.wait (%p2872_p3), %s487_s12, 256  }
  0xe9   : > { %2179 = vsyncadd (%p2872_p3), %s487_s12, 4294967040  ;;  %s499_s22 = scalar_lea.vmem [#allocation9], %s2604_s9  ;;  %p2873_p6 = scmp.eq.s32.totalorder %s2330_s23, 0 }
  0xeb   : > { %2181 = dma.done.wait (%p2873_p6), [#allocation11], 1024   ;;  %p2874_p0 = pmov %p2873_p6 }
  0xed   : > { %2183 = vsyncadd (%p2874_p0), [#allocation11], 4294966272  ;;  %p2875_p4 = pmov %p2874_p0 }
  0xee   : > { %p2876_p10 = pmov %p2874_p0 }
  0xef   : > { %2185 = dma.done.wait (%p2875_p4), [#allocation14], 1024  }
  0xf0   : > { %2187 = vsyncadd (%p2876_p10), [#allocation14], 4294966272  ;;  %v2229_v0 = vmov 0.0|0.0   ;;  %vm2230_vm0 = vmmov 0   ;;  %v2231_v1 = vmov 0.0   ;;  %v581_v2 = vld [vmem:[#allocation12] sm:$0xff]  ;;  %v900_v32 = vlaneseq }
  0xf1   : > { %1726 = vmatprep.subr.bf16.mxu0 %v2229_v0  ;;  %1667 = vmatprep.mubr.msk.f32.mxu0 %vm2230_vm0, %v2231_v1  ;;  %v582_v3 = vld [vmem:[#allocation12 + $0x8] sm:$0xff]  ;;  %v583_v4 = vld [vmem:[#allocation12 + $0x10] sm:$0xff]  ;;  %v584_v6 = vld [vmem:[#allocation12 + $0x18] sm:$0xff]  ;;  %vm585_vm1 = vcmask 261120   ;;  %vm821_vm2 = vcmask 130048   ;;  %s2232_s23 = smov 112  }
  0xf2   : > { %1732 = vmatprep.subr.bf16.mxu1 %v2229_v0  ;;  %1678 = vmatprep.mubr.msk.f32.mxu1 %vm2230_vm0, %v2231_v1  ;;  %v1727_v5 = vpack.c.bf16 %v582_v3, %v581_v2  ;;  %v1730_v7 = vpack.c.bf16 %v584_v6, %v583_v4  ;;  %v660_v8 = vld [vmem:[#allocation13] sm:$0xff]  ;;  %v661_v9 = vld [vmem:[#allocation13 + $0x8] sm:$0xff]  ;;  %v742_v15 = vld [vmem:[#allocation10 + $0x10] sm:$0xff]  ;;  %p572_p13 = scmp.lt.s32.totalorder %s2210_s20, 1  ;;  %v901_v34 = vshrl.u32 %v900_v32, 7  ;;  %v2233_v36 = vmov 0  }
  0xf3   : > { %v740_v10 = vld [vmem:[#allocation10] sm:$0xff]  ;;  %v741_v11 = vld [vmem:[#allocation10 + $0x8] sm:$0xff]  ;;  %v1733_v12 = vpack.c.bf16 %v661_v9, %v660_v8  ;;  %v743_v16 = vld [vmem:[#allocation10 + $0x18] sm:$0xff]  ;;  %vm906_vm5 = vcmask 64512   ;;  %s1609_s26 = sshll.u32 %s2601_s21, 4  ;;  %s2877_s17 = sld [smem:[#allocation29_spill]] }
  0xf4   : > { %1728 = vmatpush3.bf16.msra.mxu0 %v1727_v5  ;;  %v579_v13 = vld [vmem:[%s490_s15] sm:$0xff]  ;;  %v1739_v14 = vpack.c.bf16 %v741_v11, %v740_v10  ;;  %v1742_v17 = vpack.c.bf16 %v743_v16, %v742_v15  ;;  %v2642_v18 = vld [vmem:[%s481_s27] sm:$0xff]  ;;  %s573_s25 = scalar_select %p572_p13, %s2210_s20, 1  ;;  %v902_v35 = vsub.s32 0, %v901_v34 }
  0xf5   : > { %1729 = vmatprep.subr.bf16.mxu0 %v2229_v0  ;;  %1734 = vmatpush3.bf16.msra.mxu1 %v1733_v12  ;;  %v662_v19 = vld [vmem:[#allocation13 + $0x10] sm:$0xff]  ;;  %v663_v20 = vld [vmem:[#allocation13 + $0x18] sm:$0xff]  ;;  %v992_v49 = vld [vmem:[#allocation15] sm:$0xff]  ;;  %s2674_s8 = scalar_lea.vmem [#allocation17], %s1609_s26  ;;  %s1626_s30 = sshll.u32 %s2210_s20, 7 }
  0xf6   : > { %1735 = vmatprep.subr.bf16.mxu1 %v2229_v0  ;;  %v1736_v21 = vpack.c.bf16 %v663_v20, %v662_v19  ;;  %v580_v22 = vld [vmem:[%s499_s22] sm:$0xff]  ;;  %s574_s4 = scalar_lea.vmem %s2801_s3, %s573_s25  ;;  %v993_v50 = vld [vmem:[#allocation15 + $0x8] sm:$0xff]  ;;  %s2878_s29 = sld [smem:[#allocation38_spill]] }
  0xf7   : > { %v739_v33 = vld [vmem:[%s574_s4] sm:$0x1]  ;;  %v1745_v52 = vpack.c.bf16 %v993_v50, %v992_v49  ;;  %v1240_v9 = vld [vmem:[#allocation15 + $0x10] sm:$0xff]  ;;  %v1241_v10 = vld [vmem:[#allocation15 + $0x18] sm:$0xff]  ;;  %s1380_s13 = sshll.u32 %s2674_s8, 4  ;;  %s1353_s1 = scalar_lea.sflag [#allocation18], %s2601_s21  ;;  %s2710_s13 = int_to_ptr.vmem [resolvable:$true] %s1380_s13 }
  0xf8   : > { %1731 = vmatpush3.bf16.msra.mxu0 %v1730_v7  ;;  %vm898_vm3 = vcmp.ne.s32.totalorder %v739_v33, 0  ;;  %v1748_v12 = vpack.c.bf16 %v1241_v10, %v1240_v9  ;;  %s2092_s11 = scalar_lea.vmem %s2710_s13, 256  ;;  %s2234_s27 = smov [#allocation17]  }
  0xf9   : > { %1738 = vmatprep.subr.bf16.mxu0 %v2229_v0  ;;  %1737 = vmatpush3.bf16.msra.mxu1 %v1736_v21  ;;  %v899_v37 = vsel %vm898_vm3, 1, %v2233_v36  ;;  %p2093_p2 = scmp.ne.s32.totalorder %s2710_s13, %s2092_s11  ;;  %p2879_p1 = scmp.ne.s32.totalorder %s2877_s17, 0 }
  0xfa   : > { %1692 = vmatprep.subr.mxu1 %v2231_v1  ;;  %v903_v38 = vrot.slane %v899_v37, %v902_v35  ;;  %s2096_s24 = sshll.u32 %s2234_s27, 4  ;;  %s2097_s24 = int_to_ptr.vmem [resolvable:$false] %s2096_s24 }
  0xfb   : > { %1668 = vmatmul.mubr.msk.f32.vlgmr.msra.gmra.mrb[0].mxu0 %vm585_vm1, %v579_v13  ;;  %p2094_p12 = pnand %p2093_p2, %p2879_p1  ;;  %s2098_s12 = scalar_lea.vmem %s2097_s24, 512 }
  0xfc   : > { %1740 = vmatpush3.bf16.msra.mxu0 %v1739_v14  ;;  %1689 = vmatprep.mubr.msk.f32.mxu0 %vm2230_vm0, %v2231_v1  ;;  %vm904_vm4 = vcmp.eq.s32.totalorder %v903_v38, 1  ;;  %s2707_s6 = scalar_lea.hbm %s2878_s29, %s1626_s30  ;;  %p2099_p9 = scmp.lt.s32.totalorder %s2710_s13, %s2097_s24 }
  0xfd   : > { %1741 = vmatprep.subr.bf16.mxu0 %v2229_v0  ;;  %1679 = vmatmul.mubr.msk.f32.vlgmr.msra.gmra.mrb[0].mxu1 %vm585_vm1, %v580_v22  ;;  %p2095_p8 = pneg %p2094_p12  ;;  %p2100_p7 = scmp.lt.s32.totalorder %s2098_s12, %s2092_s11 }
  0xfe   : > { %1694 = vmatprep.mubr.msk.f32.mxu1 %vm2230_vm0, %v2231_v1 }
  0xff   : > { %p2101_p11 = por %p2100_p7, %p2099_p9 }
 0x100   : > { %1743 = vmatpush3.bf16.msra.mxu0 %v1742_v17 }
 0x101   : > { %1714 = vmatprep.subr.mxu0 %v2231_v1  ;;  %p2102_p5 = pnand %p2101_p11, %p2095_p8 }
 0x103   : > { %1690 = vmatmul.mubr.msk.f32.vlgmr.msra.gmra.mrb[2].mxu0 %vm585_vm1, %v2642_v18 }
 0x104   : > { %1716 = vmatprep.mubr.msk.f32.mxu0 %vm2230_vm0, %v2231_v1 }
 0x1ce   : > { %v655_v23 = vpop.f32.mrb[0].mxu0 }
 0x1cf   : > { %659 = vst.msk [vmem:[#allocation2] sm:$0xff] %vm585_vm1, %v655_v23  ;;  %v1669_v24 = vpop.f32.mrb[1].mxu0 }
 0x1d0   : > { %v733_v29 = vpop.f32.mrb[0].mxu1 }
 0x1d1   : > { %737 = vst.msk [vmem:[#allocation3] sm:$0xff] %vm585_vm1, %v733_v29  ;;  %v1680_v30 = vpop.f32.mrb[1].mxu1 }
 0x1d6   : > { %v1068_v25 = vld [vmem:[#allocation2] sm:$0xff]  ;;  %v814_v26 = vpop.f32.mrb[2].mxu0 }
 0x1d7   : > { %1073 = vrot.lane.b32.xlu1 %v1068_v25, %s2232_s23  ;;  %v818_v27 = vmul.f32 0.25, %v814_v26  ;;  %1693 = vmatpush3.xpose.msk.msra.mxu1 %vm821_vm2, %v1068_v25  ;;  %v1691_v28 = vpop.f32.mrb[3].mxu0 }
 0x1d8   : > { %1697 = vmatprep.subr.mxu1 %v2231_v1  ;;  %v820_v31 = vld [vmem:[#allocation3] sm:$0xff] }
 0x1da   : > { %1695 = vmatmul.mubr.msk.f32.vlgmr.msra.gmra.mrb[2].mxu1 %vm821_vm2, %v818_v27 }
 0x1db   : > { %1070 = vrot.lane.b32.xlu1 %v818_v27, %s2232_s23  ;;  %1699 = vmatprep.mubr.msk.f32.mxu1 %vm2230_vm0, %v2231_v1 }
 0x1dc   : > { %1698 = vmatpush3.msra.mxu1 %v820_v31 }
 0x1dd   : > { %1744 = vmatprep.subr.bf16.mxu1 %v2229_v0 }
 0x249   : > { %v1074_v54 = vpop.permute.xlu1 %1073 }
 0x24d   : > { %v1071_v57 = vpop.permute.xlu1 %1070 }
 0x2ad   : > { %v894_v39 = vpop.f32.mrb[2].mxu1 }
 0x2ae   : > { %v905_v40 = vsel %vm904_vm4, -inf, %v894_v39  ;;  %v1696_v41 = vpop.f32.mrb[3].mxu1 }
 0x2af   : > { %v907_v42 = vsel %vm906_vm5, %v905_v40, -inf }
 0x2b0   : > { %908 = vmax.xlane.f32.xlu0 %v907_v42 }
 0x33d   : > { %v909_v43 = vpop.xlane.xlu0 %908 }
 0x33e   : > { %v910_v44 = vsub.f32 %v905_v40, %v909_v43 }
 0x340   : > { %v911_v45 = vmul.f32 1.442695, %v910_v44 }
 0x342   : > { %1880 = vpow2.f32 %v911_v45 }
 0x34c   : > { %v1881_v46 = vpop.eup %1880 }
 0x34d   : > { %v913_v47 = vsel %vm906_vm5, %v1881_v46, 0.0 }
 0x34e   : > { %914 = vadd.xlane.f32.xlu0 %v913_v47 }
 0x3db   : > { %v915_v48 = vpop.xlane.xlu0 %914 }
 0x3dc   : > { %1882 = vrcp.f32 %v915_v48 }
 0x3e6   : > { %v1883_v51 = vpop.eup %1882 }
 0x3e7   : > { %v917_v53 = vmul.f32 %v1883_v51, %v1881_v46 }
 0x3e9   : > { %918 = vst.msk [vmem:[%s2674_s8] sm:$0xff] %vm906_vm5, %v917_v53  ;;  %1700 = vmatmul.mubr.msk.f32.vlgmr.msra.gmra.mrb[4].mxu1 %vm906_vm5, %v917_v53 }
 0x3ea   : > { %1746 = vmatpush3.bf16.msra.mxu1 %v1745_v52  ;;  %1706 = vmatprep.mubr.msk.f32.mxu1 %vm2230_vm0, %v2231_v1 }
 0x3eb   : > { %1709 = vmatprep.subr.mxu1 %v2231_v1 }
 0x4bc   : > { %v988_v55 = vpop.f32.mrb[4].mxu1 }
 0x4bd   : > { %v1701_v56 = vpop.f32.mrb[5].mxu1  ;;  %1707 = vmatmul.mubr.msk.f32.vlgmr.msra.gmra.mrb[6].mxu1 %vm821_vm2, %v988_v55 }
 0x4be   : > { %1710 = vmatpush3.xpose.msk.msra.mxu1 %vm821_vm2, %v1074_v54  ;;  %1711 = vmatprep.mubr.msk.f32.mxu1 %vm2230_vm0, %v2231_v1 }
 0x4c1   : > { %1712 = vmatmul.mubr.msk.f32.vlgmr.msra.gmra.mrb[8].mxu1 %vm821_vm2, %v1071_v57 }
 0x590   : > { %v1063_v58 = vpop.f32.mrb[6].mxu1 }
 0x591   : > { %v1708_v59 = vpop.f32.mrb[7].mxu1  ;;  %v1067_v15 = vadd.f32 %v1063_v58, %v2642_v18 }
 0x594   : > { %v1145_v60 = vpop.f32.mrb[8].mxu1 }
 0x595   : > { %v1149_v61 = vsel %vm904_vm4, -inf, %v1145_v60  ;;  %v1713_v62 = vpop.f32.mrb[9].mxu1 }
 0x596   : > { %v1150_v63 = vsel %vm906_vm5, %v1149_v61, -inf }
 0x597   : > { %1151 = vmax.xlane.f32.xlu0 %v1150_v63 }
 0x5ad   : > { %1164 = vrot.lane.b32.xlu0 %v820_v31, %s2232_s23 }
 0x624   : > { %v1152_v2 = vpop.xlane.xlu0 %1151 }
 0x625   : > { %v1153_v3 = vsub.f32 %v1149_v61, %v1152_v2 }
 0x627   : > { %v1154_v4 = vmul.f32 1.442695, %v1153_v3 }
 0x628   : > { %v1165_v5 = vpop.permute.xlu0 %1164 }
 0x629   : > { %1884 = vpow2.f32 %v1154_v4  ;;  %1715 = vmatpush3.msra.mxu0 %v1165_v5 }
 0x62a   : > { %1747 = vmatprep.subr.bf16.mxu0 %v2229_v0 }
 0x633   : > { %v1885_v6 = vpop.eup %1884 }
 0x634   : > { %v1156_v7 = vsel %vm906_vm5, %v1885_v6, 0.0 }
 0x635   : > { %1157 = vadd.xlane.f32.xlu1 %v1156_v7 }
 0x6c2   : > { %v1158_v8 = vpop.xlane.xlu1 %1157 }
 0x6c3   : > { %1886 = vrcp.f32 %v1158_v8 }
 0x6cd   : > { %v1887_v11 = vpop.eup %1886 }
 0x6ce   : > { %v1160_v13 = vmul.f32 %v1887_v11, %v1885_v6 }
 0x6d0   : > { %1619 = vst.msk [vmem:[%s2674_s8 + $0x8] sm:$0xff] %vm906_vm5, %v1160_v13  ;;  %1717 = vmatmul.mubr.msk.f32.vlgmr.msra.gmra.mrb[4].mxu0 %vm906_vm5, %v1160_v13 }
 0x6d1   : > { %1749 = vmatpush3.bf16.msra.mxu0 %v1748_v12  ;;  %1723 = vmatprep.mubr.msk.f32.mxu0 %vm2230_vm0, %v2231_v1 }
 0x7a3   : > { %v1236_v0 = vpop.f32.mrb[4].mxu0 }
 0x7a4   : > { %v1718_v14 = vpop.f32.mrb[5].mxu0  ;;  %1724 = vmatmul.mubr.msk.f32.vlgmr.msra.gmra.mrb[6].mxu0 %vm821_vm2, %v1236_v0 }
 0x877   : > { %v1311_v16 = vpop.f32.mrb[6].mxu0 }
 0x878   : > { %v1315_v17 = vadd.f32 %v1311_v16, %v1067_v15  ;;  %v1725_v19 = vpop.f32.mrb[7].mxu0 }
 0x87a   : > { %v1316_v20 = vsel %vm585_vm1, %v1315_v17, 0.0 }
 0x87b   : > { %1317 = vadd.xlane.f32.xlu0 %v1316_v20 }
 0x908   : > { %v1318_v21 = vpop.xlane.xlu0 %1317 }
 0x909   : > { %v1320_v22 = vmul.f32 0.03125, %v1318_v21 }
 0x90b   : > { %v1321_v1 = vsub.f32 %v1315_v17, %v1320_v22 }
 0x90d   : > { %v1322_v23 = vmul.f32 %v1321_v1, %v1321_v1 }
 0x90f   : > { %v1323_v24 = vsel %vm585_vm1, %v1322_v23, 0.0 }
 0x910   : > { %1324 = vadd.xlane.f32.xlu1 %v1323_v24 }
 0x911   : > { %2105 = shalt.err (!%p2102_p5)
}
 0x912   : > { %s2106_s15 = scalar_lea.hbm %s2707_s6, 256  ;;  %s2110_s25 = scalar_lea.hbm %s2878_s29, 512 }
 0x913   : > { %p2107_p3 = scmp.ne.s32.totalorder %s2707_s6, %s2106_s15  ;;  %p2111_p4 = scmp.lt.u32.totalorder %s2707_s6, %s2878_s29 }
 0x914   : > { %p2112_p10 = scmp.lt.u32.totalorder %s2110_s25, %s2106_s15  ;;  %p2114_p2 = scmp.lt.u32.totalorder %s2106_s15, %s2707_s6 }
 0x915   : > { %p2108_p6 = pnand %p2107_p3, %p2879_p1 }
 0x916   : > { %p2113_p13 = por %p2112_p10, %p2111_p4 }
 0x917   : > { %p2109_p0 = pneg %p2108_p6 }
 0x918   : > { %p2115_p12 = por %p2114_p2, %p2113_p13 }
 0x91a   : > { %p2116_p8 = pnand %p2115_p12, %p2109_p0 }
 0x91c   : > { %2119 = shalt.err (!%p2116_p8)
}
 0x91d   : > { %s2235_s4 = smov 128   ;;  %s2236_s26 = smov 256  }
 0x91e   : > { %s2237_s8 = smov 8   ;;  %s2880_s11 = sld [smem:[#allocation35_spill]] }
 0x91f   : > { %1775 = dma.vmem_to_hbm [thread:$0]  (%p2879_p1), %s2710_s13, 256, %s2707_s6, %s1353_s1, %s2235_s4, %s2236_s26, %s2237_s8  }
 0x920   : > { %s2881_s12 = sld [smem:[#allocation36_spill]]  ;;  %s564_s15 = scalar_lea.vmem [#allocation16], %s2604_s9 }
 0x921   : > { %s1367_s22 = sshll.u32 %s564_s15, 4  ;;  %s2882_s1 = sld [smem:[#allocation37_spill]]  ;;  %s2750_s22 = int_to_ptr.vmem [resolvable:$true] %s1367_s22 }
 0x922   : > { %s1348_s25 = scalar_lea.sflag [#allocation6], %s2601_s21  ;;  %s2120_s14 = scalar_lea.vmem %s2750_s22, 128 }
 0x923   : > { %p2121_p9 = scmp.ne.s32.totalorder %s2750_s22, %s2120_s14  ;;  %s2238_s9 = smov [#allocation16]  }
 0x924   : > { %v1622_v28 = vld [vmem:[%s2880_s11] ss:$0 sm:$0xff]  ;;  %s2124_s20 = sshll.u32 %s2238_s9, 4  ;;  %s2125_s20 = int_to_ptr.vmem [resolvable:$false] %s2124_s20 }
 0x925   : > { %p2122_p7 = pnand %p2121_p9, %p2879_p1  ;;  %s2126_s10 = scalar_lea.vmem %s2125_s20, 256 }
 0x926   : > { %v1623_v30 = vld [vmem:[%s2881_s12] ss:$0 sm:$0xff]  ;;  %p2127_p5 = scmp.lt.s32.totalorder %s2750_s22, %s2125_s20  ;;  %p2128_p3 = scmp.lt.s32.totalorder %s2126_s10, %s2120_s14 }
 0x927   : > { %s2748_s23 = scalar_lea.hbm %s2882_s1, %s1626_s30  ;;  %p2123_p11 = pneg %p2122_p7 }
 0x928   : > { %p2129_p6 = por %p2128_p3, %p2127_p5 }
 0x92a   : > { %p2130_p0 = pnand %p2129_p6, %p2123_p11 }
 0x99d   : > { %v1325_v18 = vpop.xlane.xlu1 %1324 }
 0x99e   : > { %v1326_v25 = vmul.f32 0.03125, %v1325_v18 }
 0x9a0   : > { %v1327_v26 = vadd.f32 1e-05, %v1326_v25 }
 0x9a2   : > { %1888 = vrsqrt.f32 %v1327_v26 }
 0x9ac   : > { %v1889_v27 = vpop.eup %1888 }
 0x9ad   : > { %v1329_v29 = vmul.f32 %v1889_v27, %v1321_v1 }
 0x9af   : > { %v1337_v31 = vmul.f32 %v1622_v28, %v1329_v29 }
 0x9b1   : > { %v1345_v32 = vadd.f32 %v1623_v30, %v1337_v31 }
 0x9b3   : > { %1346 = vst.msk [vmem:[%s564_s15] sm:$0xff] %vm585_vm1, %v1345_v32 }
 0x9b4   : > { %2133 = shalt.err (!%p2130_p0)
}
 0x9b5   : > { %s2134_s21 = scalar_lea.hbm %s2748_s23, 128  ;;  %s2138_s26 = scalar_lea.hbm %s2882_s1, 256 }
 0x9b6   : > { %p2135_p4 = scmp.ne.s32.totalorder %s2748_s23, %s2134_s21  ;;  %p2139_p2 = scmp.lt.u32.totalorder %s2748_s23, %s2882_s1 }
 0x9b7   : > { %p2140_p12 = scmp.lt.u32.totalorder %s2138_s26, %s2134_s21  ;;  %p2142_p9 = scmp.lt.u32.totalorder %s2134_s21, %s2748_s23 }
 0x9b8   : > { %p2136_p10 = pnand %p2135_p4, %p2879_p1 }
 0x9b9   : > { %p2141_p8 = por %p2140_p12, %p2139_p2 }
 0x9ba   : > { %p2137_p13 = pneg %p2136_p10 }
 0x9bb   : > { %p2143_p7 = por %p2142_p9, %p2141_p8 }
 0x9bd   : > { %p2144_p11 = pnand %p2143_p7, %p2137_p13 }
 0x9bf   : > { %2147 = shalt.err (!%p2144_p11)
}
 0x9c0   : > { %1774 = dma.vmem_to_hbm [thread:$0]  (%p2879_p1), %s2750_s22, 128, %s2748_s23, %s1348_s25  }
 0x9c1 PF: > { %s2883_s16 = sld [smem:[#allocation25_spill]]  ;;  %s2884_s11 = sld [smem:[#allocation31_spill]] }
 0x9c2   : > { %s2885_s27 = sld [smem:[#allocation27_spill]] }
 0x9c7   : > { %s1395_s24 = sand.u32 1, %s2883_s16   ;;  %p2886_p5 = scmp.ne.s32.totalorder %s2884_s11, 0 }
 0x9c8   : > { %p2887_p3 = scmp.ge.s32.totalorder %s2885_s27, 2  ;;  %s1396_s12 = scalar_lea.sflag [#allocation6], %s1395_s24 }
 0x9ca   : > { %p1802_p6 = pnand %p2887_p3, %p2886_p5 }
 0x9cc   : > { %2189 = dma.done.wait (!%p1802_p6), %s1396_s12, 128  }
 0x9cd   : > { %2191 = vsyncadd (!%p1802_p6), %s1396_s12, 4294967168  ;;  %s1405_s15 = scalar_lea.sflag [#allocation18], %s1395_s24 }
 0x9ce   : > { %2193 = dma.done.wait (!%p1802_p6), %s1405_s15, 256  }
 0x9cf   : > { %2195 = vsyncadd (!%p1802_p6), %s1405_s15, 4294967040  ;;  %s36_s22 = sadd.s32 1, %s2885_s27   ;;  %s2888_s6 = sld [smem:[#allocation30_spill]] }
 0x9d0   : > { %p33_p0 = scmp.ge.s32.totalorder %s36_s22, 4   ;;  %s2889_s20 = sld [smem:[#allocation26_spill]] }
 0x9d1   : > { %s2890_s21 = sld [smem:[#allocation28_spill]]  ;;  %s2891_s17 = smov %s2202_s18 }
 0x9d2   : > { %s2892_s18 = smov %s2206_s19  ;;  %35 = sbr.rel (!%p33_p0) target bundleno = 20 (0x14), region = 170 }
 0x9d5   : > { %s2893_s19 = smov %s2888_s6 }
 0x9d9   :  { %1410 = vsyncpa [#allocation5], 1 }
 0x9da   :  { %1412 = vsyncpa [#allocation5 + $0x1], 1 }
 0x9db   :  { %1413 = vsyncpa [#allocation8], 1 }
 0x9dc   :  { %1415 = vsyncpa [#allocation8 + $0x1], 1 }
 0x9dd   :  { %1416 = vsyncpa [#allocation11], 1 }
 0x9de   :  { %1417 = vsyncpa [#allocation14], 1 }
 0x9df   :  { %1418 = vsyncpa [#allocation6], 1 }
 0x9e0   :  { %1420 = vsyncpa [#allocation6 + $0x1], 1 }
 0x9e1   :  { %1421 = vsyncpa [#allocation18], 1 }
 0x9e2   :  { %1423 = vsyncpa [#allocation18 + $0x1], 1 }

</bundles_post_ra>
